<compile_context>
chip_gen: v7x
topology: tpu7x:2x2x1
jax: 0.10.0
libtpu: 0.0.40
codegen_flags: <defaults>
</compile_context>

<pallas_src>
import jax
import jax.numpy as jnp
from jax.experimental import pallas as pl
from jax.experimental.pallas import tpu as pltpu


def actor_mlp_kernel(x_ref, w1_ref, b1_ref, w2_ref, b2_ref, w3_ref, b3_ref, o_ref):
    # Whole (small) MLP fused in VMEM: matmuls on the MXU (f32 accumulation),
    # bias/ReLU on the VPU in f32, tanh on the EUP in f32.
    mm_dt = w1_ref.dtype                      # matmul operand dtype (bf16 or f32)

    x = x_ref[...].astype(mm_dt)              # in-kernel cast; x stays f32 in HBM

    h1 = jnp.dot(x, w1_ref[...], preferred_element_type=jnp.float32) + b1_ref[...]
    h1 = jnp.maximum(h1, 0.0)

    h2 = jnp.dot(h1.astype(mm_dt), w2_ref[...],
                 preferred_element_type=jnp.float32) + b2_ref[...]
    h2 = jnp.maximum(h2, 0.0)

    logits = jnp.dot(h2.astype(mm_dt), w3_ref[...],
                     preferred_element_type=jnp.float32) + b3_ref[...]
    o_ref[...] = (jnp.tanh(logits) * 10.0).astype(o_ref.dtype)


def _round_up(n, m):
    return ((n + m - 1) // m) * m


def prepare_params(params, matmul_dtype=jnp.bfloat16):
    """One-time weight prep: pad hidden (lane) dims to 128 and cast matmul
    operands.  Call once at init and keep the result resident across forward
    calls (the zero padding is a semantic no-op through matmul/bias/ReLU)."""
    w1, b1, w2, b2, w3, b3 = params
    obs_dim, hidden_dim = w1.shape
    action_dim = w3.shape[1]
    hid_p = _round_up(hidden_dim, 128)
    ph = hid_p - hidden_dim

    w1p = jnp.pad(w1, ((0, 0), (0, ph))).astype(matmul_dtype)    # (obs, hid_p)
    w2p = jnp.pad(w2, ((0, ph), (0, ph))).astype(matmul_dtype)   # (hid_p, hid_p)
    w3p = jnp.pad(w3, ((0, ph), (0, 0))).astype(matmul_dtype)    # (hid_p, act)
    b1p = jnp.pad(b1, ((0, 0), (0, ph))).astype(jnp.float32)     # (1, hid_p)
    b2p = jnp.pad(b2, ((0, 0), (0, ph))).astype(jnp.float32)     # (1, hid_p)
    b3p = b3.astype(jnp.float32)                                 # (1, act)
    return (w1p, b1p, w2p, b2p, w3p, b3p), (obs_dim, hid_p, action_dim)


def actor_forward(x, prepared, *, tile_b=512):
    """Fused actor MLP forward.  x: (B, obs_dim) f32 -> (B, action_dim) f32.
    `prepared` is the output of prepare_params (padded, resident weights)."""
    (w1p, b1p, w2p, b2p, w3p, b3p), (obs_dim, hid_p, action_dim) = prepared
    B = x.shape[0]
    assert x.shape[1] == obs_dim

    # Batch tile: multiple of 8 sublanes, big enough to amortize per-step
    # overhead.  Pick the demo batch so n_tiles is even (v7x megacore balance).
    TB = min(tile_b, _round_up(B, 8))
    B_p = _round_up(B, TB)
    n_tiles = B_p // TB
    if B_p != B:
        x = jnp.pad(x, ((0, B_p - B), (0, 0)))   # sublane (batch) pad only

    # Weights/biases: constant block index -> DMA'd once, VMEM-resident across
    # all grid steps.  x/out: tiled over the batch grid (auto double-buffered).
    const2d = lambda shape: pl.BlockSpec(shape, lambda i: (0, 0))
    # NOTE: if the x-tile DMA shows up exposed in a trace, add
    # pipeline_mode=pl.Buffered(3) to the x/out specs (and pl.Buffered(1) on
    # the constant weight specs to drop their unused second buffer); both are
    # tiny at these sizes so left at defaults for portability.

    out = pl.pallas_call(
        actor_mlp_kernel,
        out_shape=jax.ShapeDtypeStruct((B_p, action_dim), jnp.float32),
        grid=(n_tiles,),
        in_specs=[
            pl.BlockSpec((TB, obs_dim), lambda i: (i, 0)),  # x tile (full lane dim)
            const2d((obs_dim, hid_p)),                      # w1
            const2d((1, hid_p)),                            # b1
            const2d((hid_p, hid_p)),                        # w2
            const2d((1, hid_p)),                            # b2
            const2d((hid_p, action_dim)),                   # w3 (full lane dim)
            const2d((1, action_dim)),                       # b3
        ],
        out_specs=pl.BlockSpec((TB, action_dim), lambda i: (i, 0)),  # narrow store
        compiler_params=pltpu.CompilerParams(
            dimension_semantics=("parallel",),              # megacore on v7x
        ),
    )(x, w1p, b1p, w2p, b2p, w3p, b3p)

    return out if B_p == B else out[:B]


def init_params(key, obs_dim, action_dim, hidden_dim):
    """Deterministic, PyTorch-Linear-style uniform init (U[-1/sqrt(fan_in), +])."""
    def linear(k, fan_in, fan_out):
        kw, kb = jax.random.split(k)
        bound = 1.0 / (fan_in ** 0.5)
        w = jax.random.uniform(kw, (fan_in, fan_out), jnp.float32, -bound, bound)
        b = jax.random.uniform(kb, (1, fan_out), jnp.float32, -bound, bound)
        return w, b

    k1, k2, k3 = jax.random.split(key, 3)
    w1, b1 = linear(k1, obs_dim, hidden_dim)
    w2, b2 = linear(k2, hidden_dim, hidden_dim)
    w3, b3 = linear(k3, hidden_dim, action_dim)
    return (w1, b1, w2, b2, w3, b3)


def reference_forward(x, params):
    w1, b1, w2, b2, w3, b3 = params
    h1 = jnp.maximum(x @ w1 + b1, 0.0)
    h2 = jnp.maximum(h1 @ w2 + b2, 0.0)
    return jnp.tanh(h2 @ w3 + b3) * 10.0


if __name__ == "__main__":
    obs_dim, action_dim, hidden_dim = 32, 8, 32

    key = jax.random.PRNGKey(0)
    k_x, k_xb, k_p = jax.random.split(key, 3)
    params = init_params(k_p, obs_dim, action_dim, hidden_dim)

    # One-time weight prep (resident across calls), f32 and bf16 variants.
    prep_f32 = prepare_params(params, matmul_dtype=jnp.float32)
    prep_bf16 = prepare_params(params, matmul_dtype=jnp.bfloat16)

    # 1) Small batch (module's typical use), f32 MXU path — tight tolerance.
    x = jax.random.normal(k_x, (2, obs_dim), dtype=jnp.float32)
    out = jax.block_until_ready(actor_forward(x, prep_f32))
    ref = reference_forward(x, params)
    assert out.shape == (2, action_dim)
    assert jnp.allclose(out, ref, atol=1e-4, rtol=1e-4), "f32 small-batch mismatch"

    # 2) Large batch: 2 grid steps of TB=512 (even tile count for v7x megacore),
    #    f32 operands — tight tolerance; exercises resident-weight BlockSpecs.
    xb = jax.random.normal(k_xb, (1024, obs_dim), dtype=jnp.float32)
    out_b = jax.block_until_ready(actor_forward(xb, prep_f32, tile_b=512))
    ref_b = reference_forward(xb, params)
    assert out_b.shape == (1024, action_dim)
    assert jnp.allclose(out_b, ref_b, atol=1e-4, rtol=1e-4), "f32 batched mismatch"

    # 3) Default bf16 MXU operands (native fast path on v5e/v6e/v7x), f32
    #    accumulate + f32 elementwise — loose tolerance.
    out_bf = jax.block_until_ready(actor_forward(xb, prep_bf16, tile_b=512))
    assert jnp.allclose(out_bf, ref_b, atol=1e-1, rtol=1e-1), "bf16 batched mismatch"

    print("KERNEL_OK")
</pallas_src>

<mosaic_0001>
module attributes {stable_mosaic.version = 11 : i64} {
  func.func @actor_mlp_kernel(%arg0: i32, %arg1: memref<8x32xf32, #tpu.memory_space<vmem>>, %arg2: memref<32x128xf32, #tpu.memory_space<vmem>>, %arg3: memref<1x128xf32, #tpu.memory_space<vmem>>, %arg4: memref<128x128xf32, #tpu.memory_space<vmem>>, %arg5: memref<1x128xf32, #tpu.memory_space<vmem>>, %arg6: memref<128x8xf32, #tpu.memory_space<vmem>>, %arg7: memref<1x8xf32, #tpu.memory_space<vmem>>, %arg8: memref<8x8xf32, #tpu.memory_space<vmem>>) attributes {dimension_semantics = [#tpu.dimension_semantics<parallel>], iteration_bounds = array<i64: 1>, scalar_prefetch = 0 : i64, scratch_operands = 0 : i64, tpu.core_type = #tpu.core_type<tc>, window_params = [{transform_indices = @transform_0, window_bounds = array<i64: 8, 32>}, {pipeline_mode = #tpu.pipeline_mode<synchronous>, transform_indices = @transform_1, window_bounds = array<i64: 32, 128>}, {pipeline_mode = #tpu.pipeline_mode<synchronous>, transform_indices = @transform_2, window_bounds = array<i64: 1, 128>}, {pipeline_mode = #tpu.pipeline_mode<synchronous>, transform_indices = @transform_3, window_bounds = array<i64: 128, 128>}, {pipeline_mode = #tpu.pipeline_mode<synchronous>, transform_indices = @transform_4, window_bounds = array<i64: 1, 128>}, {pipeline_mode = #tpu.pipeline_mode<synchronous>, transform_indices = @transform_5, window_bounds = array<i64: 128, 8>}, {pipeline_mode = #tpu.pipeline_mode<synchronous>, transform_indices = @transform_6, window_bounds = array<i64: 1, 8>}, {transform_indices = @transform_7, window_bounds = array<i64: 8, 8>}]} {
    %c0 = arith.constant 0 : index
    %c0_0 = arith.constant 0 : index
    %0 = vector.load %arg1[%c0, %c0_0] : memref<8x32xf32, #tpu.memory_space<vmem>>, vector<8x32xf32>
    %c0_1 = arith.constant 0 : index
    %c0_2 = arith.constant 0 : index
    %1 = vector.load %arg2[%c0_1, %c0_2] : memref<32x128xf32, #tpu.memory_space<vmem>>, vector<32x128xf32>
    %cst = arith.constant dense<0.000000e+00> : vector<8x128xf32>
    %2 = tpu.matmul %0, %1, %cst {dimension_numbers = #tpu.dot_dimension_numbers<[1], [0], [0], [1], [0, 0, 1, 1], [], []>} : vector<8x32xf32>, vector<32x128xf32>, vector<8x128xf32> -> vector<8x128xf32>
    %c0_3 = arith.constant 0 : index
    %c0_4 = arith.constant 0 : index
    %3 = vector.load %arg3[%c0_3, %c0_4] : memref<1x128xf32, #tpu.memory_space<vmem>>, vector<1x128xf32>
    %4 = vector.broadcast %3 : vector<1x128xf32> to vector<8x128xf32>
    %5 = arith.addf %2, %4 : vector<8x128xf32>
    %cst_5 = arith.constant 0.000000e+00 : f32
    %6 = vector.broadcast %cst_5 : f32 to vector<8x128xf32>
    %7 = arith.maximumf %5, %6 : vector<8x128xf32>
    %c0_6 = arith.constant 0 : index
    %c0_7 = arith.constant 0 : index
    %8 = vector.load %arg4[%c0_6, %c0_7] : memref<128x128xf32, #tpu.memory_space<vmem>>, vector<128x128xf32>
    %cst_8 = arith.constant dense<0.000000e+00> : vector<8x128xf32>
    %9 = tpu.matmul %7, %8, %cst_8 {dimension_numbers = #tpu.dot_dimension_numbers<[1], [0], [0], [1], [0, 0, 1, 1], [], []>} : vector<8x128xf32>, vector<128x128xf32>, vector<8x128xf32> -> vector<8x128xf32>
    %c0_9 = arith.constant 0 : index
    %c0_10 = arith.constant 0 : index
    %10 = vector.load %arg5[%c0_9, %c0_10] : memref<1x128xf32, #tpu.memory_space<vmem>>, vector<1x128xf32>
    %11 = vector.broadcast %10 : vector<1x128xf32> to vector<8x128xf32>
    %12 = arith.addf %9, %11 : vector<8x128xf32>
    %cst_11 = arith.constant 0.000000e+00 : f32
    %13 = vector.broadcast %cst_11 : f32 to vector<8x128xf32>
    %14 = arith.maximumf %12, %13 : vector<8x128xf32>
    %c0_12 = arith.constant 0 : index
    %c0_13 = arith.constant 0 : index
    %15 = vector.load %arg6[%c0_12, %c0_13] : memref<128x8xf32, #tpu.memory_space<vmem>>, vector<128x8xf32>
    %cst_14 = arith.constant dense<0.000000e+00> : vector<8x8xf32>
    %16 = tpu.matmul %14, %15, %cst_14 {dimension_numbers = #tpu.dot_dimension_numbers<[1], [0], [0], [1], [0, 0, 1, 1], [], []>} : vector<8x128xf32>, vector<128x8xf32>, vector<8x8xf32> -> vector<8x8xf32>
    %c0_15 = arith.constant 0 : index
    %c0_16 = arith.constant 0 : index
    %17 = vector.load %arg7[%c0_15, %c0_16] : memref<1x8xf32, #tpu.memory_space<vmem>>, vector<1x8xf32>
    %18 = vector.broadcast %17 : vector<1x8xf32> to vector<8x8xf32>
    %19 = arith.addf %16, %18 : vector<8x8xf32>
    %20 = math.tanh %19 : vector<8x8xf32>
    %cst_17 = arith.constant 1.000000e+01 : f32
    %21 = vector.broadcast %cst_17 : f32 to vector<8x8xf32>
    %22 = arith.mulf %20, %21 : vector<8x8xf32>
    %c0_18 = arith.constant 0 : index
    %c0_19 = arith.constant 0 : index
    %23 = vector.load %arg8[%c0_18, %c0_19] : memref<8x8xf32, #tpu.memory_space<vmem>>, vector<8x8xf32>
    tpu.vector_store %arg8[%c0_18, %c0_19], %22 {strides = array<i32>} : memref<8x8xf32, #tpu.memory_space<vmem>>, vector<8x8xf32>,
    return
  }
  func.func @transform_0(%arg0: i32) -> (i32, i32) {
    %c0_i32 = arith.constant 0 : i32
    %c0_i32_0 = arith.constant 0 : i32
    return %arg0, %c0_i32 : i32, i32
  }
  func.func @transform_1(%arg0: i32) -> (i32, i32) {
    %c0_i32 = arith.constant 0 : i32
    %c0_i32_0 = arith.constant 0 : i32
    %c0_i32_1 = arith.constant 0 : i32
    return %c0_i32, %c0_i32_0 : i32, i32
  }
  func.func @transform_2(%arg0: i32) -> (i32, i32) {
    %c0_i32 = arith.constant 0 : i32
    %c0_i32_0 = arith.constant 0 : i32
    %c0_i32_1 = arith.constant 0 : i32
    return %c0_i32, %c0_i32_0 : i32, i32
  }
  func.func @transform_3(%arg0: i32) -> (i32, i32) {
    %c0_i32 = arith.constant 0 : i32
    %c0_i32_0 = arith.constant 0 : i32
    %c0_i32_1 = arith.constant 0 : i32
    return %c0_i32, %c0_i32_0 : i32, i32
  }
  func.func @transform_4(%arg0: i32) -> (i32, i32) {
    %c0_i32 = arith.constant 0 : i32
    %c0_i32_0 = arith.constant 0 : i32
    %c0_i32_1 = arith.constant 0 : i32
    return %c0_i32, %c0_i32_0 : i32, i32
  }
  func.func @transform_5(%arg0: i32) -> (i32, i32) {
    %c0_i32 = arith.constant 0 : i32
    %c0_i32_0 = arith.constant 0 : i32
    %c0_i32_1 = arith.constant 0 : i32
    return %c0_i32, %c0_i32_0 : i32, i32
  }
  func.func @transform_6(%arg0: i32) -> (i32, i32) {
    %c0_i32 = arith.constant 0 : i32
    %c0_i32_0 = arith.constant 0 : i32
    %c0_i32_1 = arith.constant 0 : i32
    return %c0_i32, %c0_i32_0 : i32, i32
  }
  func.func @transform_7(%arg0: i32) -> (i32, i32) {
    %c0_i32 = arith.constant 0 : i32
    %c0_i32_0 = arith.constant 0 : i32
    return %arg0, %c0_i32 : i32, i32
  }
}

</mosaic_0001>

<bundles_post_ra>
// kernel: tpu_custom_call.1
= control target key start
LH: loop header
LB: loop body
LE: loop exit
PB: predicated region body
PF: predicated region fallthrough
CT: control target
= control target key end

     0   :  { %12 = vsyncpa [#allocation3], 0  ;;  %s769_s0 = inlined_call_operand.vmem [shape: f32[8,32], index: 0, kind: input, shape index: {}]   ;;  %s770_s1 = inlined_call_operand.hbm [shape: f32[32,128], index: 1, kind: input, shape index: {}]   ;;  %s771_s2 = inlined_call_operand.vmem [shape: f32[1,128], index: 2, kind: input, shape index: {}]   ;;  %s772_s3 = inlined_call_operand.vmem [shape: f32[128,128], index: 3, kind: input, shape index: {}]   ;;  %s773_s4 = inlined_call_operand.vmem [shape: f32[1,128], index: 4, kind: input, shape index: {}]   ;;  %s774_s5 = inlined_call_operand.vmem [shape: f32[128,8], index: 5, kind: input, shape index: {}]   ;;  %s775_s6 = inlined_call_operand.vmem [shape: f32[1,8], index: 6, kind: input, shape index: {}]   ;;  %s776_s7 = inlined_call_operand.hbm [shape: f32[8,8], index: 7, kind: output, shape index: {}]  }
   0x1   :  { %13 = vsyncpa [#allocation4], 0  ;;  %s569_s24 = smov [#allocation2]   ;;  %s521_s28 = scalar_lea.hbm %s770_s1, 512 }
   0x2   :  { %s21_s25 = sshll.u32 %s569_s24, 4  ;;  %p522_p0 = scmp.ne.s32.totalorder %s770_s1, %s521_s28  ;;  %s22_s25 = int_to_ptr.vmem [resolvable:$true] %s21_s25 }
   0x3   :  { %p525_p1 = scmp.lt.u32.totalorder %s521_s28, %s770_s1 }
   0x5   :  { %p527_p2 = pnand %p525_p1, %p522_p0 }
   0x7   :  { %530 = shalt.err (!%p527_p2)
}
   0x8   :  { %s531_s10 = scalar_lea.vmem %s22_s25, 512  ;;  %p536_p4 = scmp.lt.s32.totalorder %s22_s25, %s22_s25 }
   0x9   :  { %p532_p3 = scmp.ne.s32.totalorder %s22_s25, %s531_s10  ;;  %p537_p5 = scmp.lt.s32.totalorder %s531_s10, %s531_s10 }
   0xb   :  { %p538_p6 = por %p537_p5, %p536_p4 }
   0xd   :  { %p539_p7 = pnand %p538_p6, %p532_p3 }
   0xf   :  { %542 = shalt.err (!%p539_p7)
}
  0x10   :  { %s570_s11 = smov 128   ;;  %s571_s12 = smov 8  }
  0x11   :  { %27 = dma.hbm_to_vmem [thread:$0]  %s770_s1, 512, %s22_s25, [#allocation3], %s570_s11, %s570_s11, %s571_s12  }
  0x12   :  { %565 = dma.done.wait [#allocation3], 512  }
  0x13   :  { %566 = vsyncadd [#allocation3], 4294966784  ;;  %v572_v0 = vmov 0.0|0.0   ;;  %vm573_vm0 = vmmov 0   ;;  %v574_v1 = vmov 0.0   ;;  %v42_v2 = vld [vmem:[#allocation2] sm:$0xff] }
  0x14   :  { %458 = vmatprep.subr.bf16.mxu0 %v572_v0  ;;  %385 = vmatprep.mubr.msk.f32.mxu0 %vm573_vm0, %v574_v1  ;;  %v43_v3 = vld [vmem:[#allocation2 + $0x8] sm:$0xff]  ;;  %v44_v4 = vld [vmem:[#allocation2 + $0x10] sm:$0xff]  ;;  %v45_v6 = vld [vmem:[#allocation2 + $0x18] sm:$0xff]  ;;  %vm53_vm1 = vcmask 261120   ;;  %vm317_vm2 = vcmask 64512  }
  0x15   :  { %464 = vmatprep.subr.bf16.mxu1 %v572_v0  ;;  %420 = vmatprep.mubr.msk.f32.mxu1 %vm573_vm0, %v574_v1  ;;  %v459_v5 = vpack.c.bf16 %v43_v3, %v42_v2  ;;  %v128_v7 = vld [vmem:[%s772_s3] sm:$0xff]  ;;  %v129_v8 = vld [vmem:[%s772_s3 + $0x8] sm:$0xff]  ;;  %v130_v9 = vld [vmem:[%s772_s3 + $0x10] sm:$0xff]  ;;  %v462_v11 = vpack.c.bf16 %v45_v6, %v44_v4 }
  0x16   :  { %v131_v10 = vld [vmem:[%s772_s3 + $0x18] sm:$0xff]  ;;  %v465_v12 = vpack.c.bf16 %v129_v8, %v128_v7  ;;  %v132_v14 = vld [vmem:[%s772_s3 + $0x20] sm:$0xff]  ;;  %v133_v15 = vld [vmem:[%s772_s3 + $0x28] sm:$0xff] }
  0x17   :  { %460 = vmatpush3.bf16.msra.mxu0 %v459_v5  ;;  %v468_v13 = vpack.c.bf16 %v131_v10, %v130_v9  ;;  %v41_v16 = vld [vmem:[%s769_s0] sm:$0xff]  ;;  %v471_v17 = vpack.c.bf16 %v133_v15, %v132_v14  ;;  %v134_v18 = vld [vmem:[%s772_s3 + $0x30] sm:$0xff]  ;;  %v135_v19 = vld [vmem:[%s772_s3 + $0x38] sm:$0xff] }
  0x18   :  { %461 = vmatprep.subr.bf16.mxu0 %v572_v0  ;;  %466 = vmatpush3.bf16.msra.mxu1 %v465_v12  ;;  %v474_v20 = vpack.c.bf16 %v135_v19, %v134_v18  ;;  %v136_v21 = vld [vmem:[%s772_s3 + $0x40] sm:$0xff]  ;;  %v137_v22 = vld [vmem:[%s772_s3 + $0x48] sm:$0xff]  ;;  %v138_v24 = vld [vmem:[%s772_s3 + $0x50] sm:$0xff] }
  0x19   :  { %467 = vmatprep.subr.bf16.mxu1 %v572_v0  ;;  %v477_v23 = vpack.c.bf16 %v137_v22, %v136_v21  ;;  %v139_v25 = vld [vmem:[%s772_s3 + $0x58] sm:$0xff]  ;;  %v140_v27 = vld [vmem:[%s772_s3 + $0x60] sm:$0xff]  ;;  %v141_v28 = vld [vmem:[%s772_s3 + $0x68] sm:$0xff] }
  0x1a   :  { %v480_v26 = vpack.c.bf16 %v139_v25, %v138_v24  ;;  %v483_v29 = vpack.c.bf16 %v141_v28, %v140_v27  ;;  %v142_v30 = vld [vmem:[%s772_s3 + $0x70] sm:$0xff]  ;;  %v143_v31 = vld [vmem:[%s772_s3 + $0x78] sm:$0xff]  ;;  %v222_v33 = vld [vmem:[%s774_s5] sm:$0xff] }
  0x1b   :  { %463 = vmatpush3.bf16.msra.mxu0 %v462_v11  ;;  %v486_v32 = vpack.c.bf16 %v143_v31, %v142_v30  ;;  %v223_v34 = vld [vmem:[%s774_s5 + $0x8] sm:$0xff]  ;;  %v224_v35 = vld [vmem:[%s774_s5 + $0x10] sm:$0xff]  ;;  %v225_v37 = vld [vmem:[%s774_s5 + $0x18] sm:$0xff] }
  0x1c   :  { %488 = vmatprep.subr.bf16.mxu0 %v572_v0  ;;  %469 = vmatpush3.bf16.msra.mxu1 %v468_v13  ;;  %v489_v36 = vpack.c.bf16 %v223_v34, %v222_v33  ;;  %v492_v38 = vpack.c.bf16 %v225_v37, %v224_v35  ;;  %v226_v39 = vld [vmem:[%s774_s5 + $0x20] sm:$0xff]  ;;  %v227_v40 = vld [vmem:[%s774_s5 + $0x28] sm:$0xff]  ;;  %v228_v42 = vld [vmem:[%s774_s5 + $0x30] sm:$0xff] }
  0x1d   :  { %470 = vmatprep.subr.bf16.mxu1 %v572_v0  ;;  %v495_v41 = vpack.c.bf16 %v227_v40, %v226_v39  ;;  %v229_v43 = vld [vmem:[%s774_s5 + $0x38] sm:$0xff]  ;;  %v230_v45 = vld [vmem:[%s774_s5 + $0x40] sm:$0xff]  ;;  %v231_v46 = vld [vmem:[%s774_s5 + $0x48] sm:$0xff] }
  0x1e   :  { %386 = vmatmul.mubr.msk.f32.vlgmr.msra.gmra.mrb[0].mxu0 %vm53_vm1, %v41_v16  ;;  %v498_v44 = vpack.c.bf16 %v229_v43, %v228_v42  ;;  %v501_v47 = vpack.c.bf16 %v231_v46, %v230_v45  ;;  %v232_v48 = vld [vmem:[%s774_s5 + $0x50] sm:$0xff]  ;;  %v233_v49 = vld [vmem:[%s774_s5 + $0x58] sm:$0xff]  ;;  %v234_v51 = vld [vmem:[%s774_s5 + $0x60] sm:$0xff] }
  0x1f   :  { %455 = vmatprep.mubr.msk.f32.mxu0 %vm573_vm0, %v574_v1  ;;  %490 = vmatpush3.bf16.msra.mxu0 %v489_v36  ;;  %v504_v50 = vpack.c.bf16 %v233_v49, %v232_v48  ;;  %v235_v52 = vld [vmem:[%s774_s5 + $0x68] sm:$0xff]  ;;  %v334_v54 = vld [vmem:[%s771_s2] ss:$0 sm:$0xff]  ;;  %v236_v59 = vld [vmem:[%s774_s5 + $0x70] sm:$0xff] }
  0x20   :  { %472 = vmatpush3.bf16.msra.mxu1 %v471_v17  ;;  %491 = vmatprep.subr.bf16.mxu0 %v572_v0  ;;  %v507_v53 = vpack.c.bf16 %v235_v52, %v234_v51  ;;  %v237_v60 = vld [vmem:[%s774_s5 + $0x78] sm:$0xff]  ;;  %v336_v62 = vld [vmem:[%s773_s4] ss:$0 sm:$0xff]  ;;  %s575_s5 = smov [#allocation5]  }
  0x21   :  { %473 = vmatprep.subr.bf16.mxu1 %v572_v0  ;;  %v510_v61 = vpack.c.bf16 %v237_v60, %v236_v59  ;;  %v337_v3 = vld [vmem:[%s775_s6] ss:$0 sm:$0xff]  ;;  %s325_s9 = sshll.u32 %s575_s5, 4  ;;  %s326_s9 = int_to_ptr.vmem [resolvable:$true] %s325_s9 }
  0x22   :  { %s543_s4 = scalar_lea.vmem %s326_s9, 128  ;;  %p548_p9 = scmp.lt.s32.totalorder %s326_s9, %s326_s9 }
  0x23   :  { %493 = vmatpush3.bf16.msra.mxu0 %v492_v38  ;;  %p544_p8 = scmp.ne.s32.totalorder %s326_s9, %s543_s4  ;;  %p549_p10 = scmp.lt.s32.totalorder %s543_s4, %s543_s4 }
  0x24   :  { %475 = vmatpush3.bf16.msra.mxu1 %v474_v20  ;;  %494 = vmatprep.subr.bf16.mxu0 %v572_v0 }
  0x25   :  { %476 = vmatprep.subr.bf16.mxu1 %v572_v0  ;;  %p550_p11 = por %p549_p10, %p548_p9 }
  0x27   :  { %496 = vmatpush3.bf16.msra.mxu0 %v495_v41  ;;  %p551_p12 = pnand %p550_p11, %p544_p8 }
  0x28   :  { %478 = vmatpush3.bf16.msra.mxu1 %v477_v23  ;;  %497 = vmatprep.subr.bf16.mxu0 %v572_v0 }
  0x29   :  { %479 = vmatprep.subr.bf16.mxu1 %v572_v0 }
  0x2b   :  { %499 = vmatpush3.bf16.msra.mxu0 %v498_v44 }
  0x2c   :  { %481 = vmatpush3.bf16.msra.mxu1 %v480_v26  ;;  %500 = vmatprep.subr.bf16.mxu0 %v572_v0 }
  0x2d   :  { %482 = vmatprep.subr.bf16.mxu1 %v572_v0 }
  0x2f   :  { %502 = vmatpush3.bf16.msra.mxu0 %v501_v47 }
  0x30   :  { %484 = vmatpush3.bf16.msra.mxu1 %v483_v29  ;;  %503 = vmatprep.subr.bf16.mxu0 %v572_v0 }
  0x31   :  { %485 = vmatprep.subr.bf16.mxu1 %v572_v0 }
  0x33   :  { %505 = vmatpush3.bf16.msra.mxu0 %v504_v50 }
  0x34   :  { %487 = vmatpush3.bf16.msra.mxu1 %v486_v32  ;;  %506 = vmatprep.subr.bf16.mxu0 %v572_v0 }
  0x37   :  { %508 = vmatpush3.bf16.msra.mxu0 %v507_v53 }
  0x38   :  { %509 = vmatprep.subr.bf16.mxu0 %v572_v0 }
  0x3b   :  { %511 = vmatpush3.bf16.msra.mxu0 %v510_v61 }
  0xf1   :  { %v123_v55 = vpop.f32.mrb[0].mxu0 }
  0xf2   :  { %v124_v56 = vadd.f32 %v334_v54, %v123_v55  ;;  %v387_v57 = vpop.f32.mrb[1].mxu0 }
  0xf4   :  { %v127_v58 = vmax.f32 %v124_v56, 0.0 }
  0xf6   :  { %421 = vmatmul.mubr.f32.vlgmr.msra.gmra.mrb[0].mxu1 %v127_v58 }
 0x1c9   :  { %v217_v63 = vpop.f32.mrb[0].mxu1 }
 0x1ca   :  { %v218_v0 = vadd.f32 %v336_v62, %v217_v63  ;;  %v422_v1 = vpop.f32.mrb[1].mxu1 }
 0x1cc   :  { %v221_v2 = vmax.f32 %v218_v0, 0.0 }
 0x1ce   :  { %456 = vmatmul.mubr.f32.vlgmr.msra.gmra.mrb[2].mxu0 %v221_v2 }
 0x2a1   :  { %v311_v4 = vpop.f32.mrb[2].mxu0 }
 0x2a2   :  { %v312_v5 = vadd.f32 %v337_v3, %v311_v4  ;;  %v457_v6 = vpop.f32.mrb[3].mxu0 }
 0x2a4   :  { %519 = vtanh.f32 %v312_v5 }
 0x2ae   :  { %v520_v7 = vpop.eup %519 }
 0x2af   :  { %v316_v8 = vmul.f32 10.0, %v520_v7 }
 0x2b1   :  { %318 = vst.msk [vmem:[#allocation5] sm:$0xff] %vm317_vm2, %v316_v8 }
 0x2b2   :  { %554 = shalt.err (!%p551_p12)
}
 0x2b3   :  { %s555_s11 = scalar_lea.hbm %s776_s7, 128 }
 0x2b4   :  { %p556_p13 = scmp.ne.s32.totalorder %s776_s7, %s555_s11  ;;  %p559_p0 = scmp.lt.u32.totalorder %s555_s11, %s776_s7 }
 0x2b6   :  { %p561_p1 = pnand %p559_p0, %p556_p13 }
 0x2b8   :  { %564 = shalt.err (!%p561_p1)
}
 0x2b9   :  { %328 = dma.vmem_to_hbm [thread:$0]  %s326_s9, 128, %s776_s7, [#allocation4]  }
 0x2ba   :  { %567 = dma.done.wait [#allocation4], 128  }
 0x2bb   :  { %568 = vsyncadd [#allocation4], 4294967168 }
 0x2bc   :  { %332 = vsyncpa [#allocation3], 1 }
 0x2bd   :  { %333 = vsyncpa [#allocation4], 1 }

</bundles_post_ra>
